<compile_context>
chip_gen: v7x
topology: tpu7x:2x2x1
jax: 0.10.0
libtpu: 0.0.40
codegen_flags: <defaults>
</compile_context>

<pallas_src>
import functools

import jax
import jax.numpy as jnp
from jax.experimental import pallas as pl
from jax.experimental.pallas import tpu as pltpu


# ----------------------------------------------------------------------------
# Pallas kernel: streaming CE + fused center gather + per-row squared error
# ----------------------------------------------------------------------------
def _trunk_loss_kernel(labels_ref, logits_ref, emb_ref, cent_ref, out_ref,
                       m_sc, l_sc, t_sc, g_sc, *, num_classes, mask_classes):
    j = pl.program_id(1)                       # class-tile index (reduction)
    tb, tc = logits_ref.shape

    @pl.when(j == 0)
    def _init():
        m_sc[...] = jnp.full_like(m_sc, -jnp.inf)
        l_sc[...] = jnp.zeros_like(l_sc)
        t_sc[...] = jnp.zeros_like(t_sc)
        g_sc[...] = jnp.zeros_like(g_sc)

    logits = logits_ref[...].astype(jnp.float32)                   # (tb, tc)
    labels = labels_ref[...]                                       # (tb, 1) int32
    cls = jax.lax.broadcasted_iota(jnp.int32, (tb, tc), 1) + j * tc
    if mask_classes:
        # Class-tail padding of the last class tile: kill garbage columns.
        logits = jnp.where(cls < num_classes, logits, -jnp.inf)
    is_label = cls == labels                                       # (tb, tc) bool

    # --- online logsumexp over class tiles ---
    m_prev = m_sc[...]
    m_new = jnp.maximum(m_prev, jnp.max(logits, axis=-1, keepdims=True))
    alpha = jnp.exp(m_prev - m_new)
    l_sc[...] = alpha * l_sc[...] + jnp.sum(jnp.exp(logits - m_new),
                                            axis=-1, keepdims=True)
    m_sc[...] = m_new

    # --- picked (true-label) logit: exactly one class tile matches per row ---
    t_sc[...] += jnp.sum(jnp.where(is_label, logits, 0.0),
                         axis=-1, keepdims=True)

    # --- fused centers[labels] gather: one-hot @ centers tile on the MXU ---
    cent = cent_ref[...].astype(jnp.float32)                       # (tc, D)
    if mask_classes:
        rows = jax.lax.broadcasted_iota(jnp.int32, cent.shape, 0) + j * tc
        cent = jnp.where(rows < num_classes, cent, 0.0)
    onehot = is_label.astype(jnp.float32)
    g_sc[...] += jnp.dot(onehot, cent, preferred_element_type=jnp.float32)

    @pl.when(j == pl.num_programs(1) - 1)
    def _finalize():
        lse = m_sc[...] + jnp.log(l_sc[...])                       # (tb, 1)
        ce_row = lse - t_sc[...]                                   # (tb, 1)
        diff = emb_ref[...].astype(jnp.float32) - g_sc[...]        # (tb, D)
        sq_row = jnp.sum(diff * diff, axis=-1, keepdims=True)      # (tb, 1)
        lane = jax.lax.broadcasted_iota(jnp.int32, out_ref.shape, 1)
        out_ref[...] = jnp.where(lane == 0, ce_row,
                                 jnp.where(lane == 1, sq_row, 0.0))


def _round_up(x, m):
    return ((x + m - 1) // m) * m


def trunk_loss_pallas(embeddings, logits, labels, centers, beta,
                      *, tb=256, tc=512):
    """total = CE(logits, labels).mean() + beta * MSE(embeddings, centers[labels])."""
    B, C = logits.shape
    K, D = centers.shape
    assert K == C, "center buffer must have one row per class"

    tb = min(tb, _round_up(B, 8))
    tc = min(tc, _round_up(C, 128))
    grid = (pl.cdiv(B, tb), pl.cdiv(C, tc))

    labels2d = labels.astype(jnp.int32).reshape(B, 1)

    kernel = functools.partial(_trunk_loss_kernel,
                               num_classes=C,
                               mask_classes=(C % tc != 0))

    partials = pl.pallas_call(
        kernel,
        out_shape=jax.ShapeDtypeStruct((B, 128), jnp.float32),
        grid_spec=pltpu.PrefetchScalarGridSpec(
            num_scalar_prefetch=0,
            grid=grid,
            in_specs=[
                pl.BlockSpec((tb, 1), lambda i, j: (i, 0)),    # labels
                pl.BlockSpec((tb, tc), lambda i, j: (i, j)),   # logits (streamed)
                pl.BlockSpec((tb, D), lambda i, j: (i, 0)),    # embeddings
                pl.BlockSpec((tc, D), lambda i, j: (j, 0)),    # centers
            ],
            out_specs=pl.BlockSpec((tb, 128), lambda i, j: (i, 0)),
            scratch_shapes=[
                pltpu.VMEM((tb, 1), jnp.float32),   # running max
                pltpu.VMEM((tb, 1), jnp.float32),   # running sum-exp
                pltpu.VMEM((tb, 1), jnp.float32),   # picked (true) logit
                pltpu.VMEM((tb, D), jnp.float32),   # gathered centers
            ],
        ),
        compiler_params=pltpu.CompilerParams(
            dimension_semantics=("parallel", "arbitrary"),
            vmem_limit_bytes=32 * 1024 * 1024,
        ),
    )(labels2d, logits, embeddings, centers)

    # Tiny final reduce in plain JAX (keeps the batch grid axis "parallel").
    ce = jnp.sum(partials[:, 0]) / jnp.float32(B)
    mse = jnp.sum(partials[:, 1]) / jnp.float32(B * D)
    return ce + jnp.float32(beta) * mse


# ----------------------------------------------------------------------------
# Plain-JAX glue: CenterBuffer momentum update (stateful bookkeeping)
# ----------------------------------------------------------------------------
def update_centers(centers, embeddings, labels, update_factor):
    # TODO(synk): CenterBuffer source not provided; implements a standard
    # momentum EMA of each present class center towards its per-class batch
    # mean (segment_sum avoids materializing a dense (B, K) one-hot).
    K = centers.shape[0]
    sums = jax.ops.segment_sum(embeddings, labels, num_segments=K)
    counts = jax.ops.segment_sum(
        jnp.ones(labels.shape, embeddings.dtype), labels, num_segments=K)
    means = sums / jnp.maximum(counts[:, None], 1.0)
    present = (counts > 0)[:, None]
    updated = update_factor * centers + (1.0 - update_factor) * means
    return jnp.where(present, updated, centers)


class TrunkLossPallas:
    """Pallas/JAX port of TrunkLoss (trunk_miner=None path)."""

    def __init__(self, num_classes, num_dimensions, update_factor=0.6,
                 beta=0.008):
        self.num_classes = num_classes
        self.num_dimensions = num_dimensions
        self.update_factor = update_factor
        self.beta = beta
        # Deterministic synthetic init of the center buffer (no checkpoint).
        key = jax.random.PRNGKey(42)
        self.centers = jax.random.normal(
            key, (num_classes, num_dimensions), dtype=jnp.float32) * 0.1

    def __call__(self, embeddings, logits, labels):
        # Matches the PyTorch module: update first, then compute the loss
        # against the post-update centers (self.center.update -> get_centers).
        self.centers = update_centers(self.centers, embeddings, labels,
                                      self.update_factor)
        return trunk_loss_pallas(embeddings, logits, labels, self.centers,
                                 self.beta)


# ----------------------------------------------------------------------------
# Demo / smoke test
# ----------------------------------------------------------------------------
if __name__ == "__main__":
    B, C, D = 8, 16, 32      # batch, num_classes, embedding dim

    key = jax.random.PRNGKey(0)
    k_emb, k_log, k_lab = jax.random.split(key, 3)
    embeddings = jax.random.normal(k_emb, (B, D), dtype=jnp.float32)
    logits = jax.random.normal(k_log, (B, C), dtype=jnp.float32)
    labels = jax.random.randint(k_lab, (B,), 0, C, dtype=jnp.int32)

    loss_mod = TrunkLossPallas(num_classes=C, num_dimensions=D,
                               update_factor=0.6, beta=0.008)
    total_loss = loss_mod(embeddings, logits, labels)
    total_loss = jax.block_until_ready(total_loss)

    # Reference (plain JAX, same math, post-update centers).
    centers_for_batch = jnp.take(loss_mod.centers, labels, axis=0)
    lse = jax.nn.logsumexp(logits, axis=-1)
    ce_ref = jnp.mean(lse - logits[jnp.arange(B), labels])
    mse_ref = jnp.mean((embeddings - centers_for_batch) ** 2)
    ref = ce_ref + 0.008 * mse_ref
    assert jnp.allclose(total_loss, ref, atol=1e-5, rtol=1e-5), (total_loss, ref)

    # Multi-tile correctness check: exercises batch tiling, class tiling,
    # in-kernel class-tail masking and the online logsumexp / accumulator path.
    B2, C2, D2 = 24, 300, 32
    k1, k2, k3, k4 = jax.random.split(jax.random.PRNGKey(1), 4)
    emb2 = jax.random.normal(k1, (B2, D2), dtype=jnp.float32)
    log2 = jax.random.normal(k2, (B2, C2), dtype=jnp.float32)
    lab2 = jax.random.randint(k3, (B2,), 0, C2, dtype=jnp.int32)
    cent2 = jax.random.normal(k4, (C2, D2), dtype=jnp.float32) * 0.1
    got2 = jax.block_until_ready(
        trunk_loss_pallas(emb2, log2, lab2, cent2, 0.008, tb=8, tc=128))
    lse2 = jax.nn.logsumexp(log2, axis=-1)
    ce2 = jnp.mean(lse2 - log2[jnp.arange(B2), lab2])
    mse2 = jnp.mean((emb2 - cent2[lab2]) ** 2)
    ref2 = ce2 + 0.008 * mse2
    assert jnp.allclose(got2, ref2, atol=1e-4, rtol=1e-4), (got2, ref2)

    print("KERNEL_OK")
</pallas_src>

<mosaic_0001>
module attributes {stable_mosaic.version = 11 : i64} {
  func.func @_trunk_loss_kernel(%arg0: i32, %arg1: i32, %arg2: memref<8x1xi32, #tpu.memory_space<vmem>>, %arg3: memref<8x128xf32, #tpu.memory_space<vmem>>, %arg4: memref<8x32xf32, #tpu.memory_space<vmem>>, %arg5: memref<128x32xf32, #tpu.memory_space<vmem>>, %arg6: memref<8x128xf32, #tpu.memory_space<vmem>>, %arg7: memref<8x1xf32, #tpu.memory_space<vmem>>, %arg8: memref<8x1xf32, #tpu.memory_space<vmem>>, %arg9: memref<8x1xf32, #tpu.memory_space<vmem>>, %arg10: memref<8x32xf32, #tpu.memory_space<vmem>>) attributes {dimension_semantics = [#tpu.dimension_semantics<parallel>, #tpu.dimension_semantics<arbitrary>], iteration_bounds = array<i64: 1, 1>, scalar_prefetch = 0 : i64, scratch_operands = 4 : i64, tpu.core_type = #tpu.core_type<tc>, window_params = [{transform_indices = @transform_0, window_bounds = array<i64: 8, 1>}, {transform_indices = @transform_1, window_bounds = array<i64: 8, 128>}, {transform_indices = @transform_2, window_bounds = array<i64: 8, 32>}, {transform_indices = @transform_3, window_bounds = array<i64: 128, 32>}, {transform_indices = @transform_4, window_bounds = array<i64: 8, 128>}]} {
    %c0_i32 = arith.constant 0 : i32
    %0 = arith.cmpi eq, %arg1, %c0_i32 : i32
    %1 = arith.extui %0 : i1 to i32
    %c0_i32_0 = arith.constant 0 : i32
    %2 = arith.cmpi ne, %1, %c0_i32_0 : i32
    scf.if %2 {
      %cst_32 = arith.constant 0xFF800000 : f32
      %56 = vector.broadcast %cst_32 : f32 to vector<8x1xf32>
      %c0_33 = arith.constant 0 : index
      %c0_34 = arith.constant 0 : index
      %57 = vector.load %arg7[%c0_33, %c0_34] : memref<8x1xf32, #tpu.memory_space<vmem>>, vector<8x1xf32>
      tpu.vector_store %arg7[%c0_33, %c0_34], %56 {strides = array<i32>} : memref<8x1xf32, #tpu.memory_space<vmem>>, vector<8x1xf32>,
      %cst_35 = arith.constant 0.000000e+00 : f32
      %58 = vector.broadcast %cst_35 : f32 to vector<8x1xf32>
      %c0_36 = arith.constant 0 : index
      %c0_37 = arith.constant 0 : index
      %59 = vector.load %arg8[%c0_36, %c0_37] : memref<8x1xf32, #tpu.memory_space<vmem>>, vector<8x1xf32>
      tpu.vector_store %arg8[%c0_36, %c0_37], %58 {strides = array<i32>} : memref<8x1xf32, #tpu.memory_space<vmem>>, vector<8x1xf32>,
      %cst_38 = arith.constant 0.000000e+00 : f32
      %60 = vector.broadcast %cst_38 : f32 to vector<8x1xf32>
      %c0_39 = arith.constant 0 : index
      %c0_40 = arith.constant 0 : index
      %61 = vector.load %arg9[%c0_39, %c0_40] : memref<8x1xf32, #tpu.memory_space<vmem>>, vector<8x1xf32>
      tpu.vector_store %arg9[%c0_39, %c0_40], %60 {strides = array<i32>} : memref<8x1xf32, #tpu.memory_space<vmem>>, vector<8x1xf32>,
      %cst_41 = arith.constant 0.000000e+00 : f32
      %62 = vector.broadcast %cst_41 : f32 to vector<8x32xf32>
      %c0_42 = arith.constant 0 : index
      %c0_43 = arith.constant 0 : index
      %63 = vector.load %arg10[%c0_42, %c0_43] : memref<8x32xf32, #tpu.memory_space<vmem>>, vector<8x32xf32>
      tpu.vector_store %arg10[%c0_42, %c0_43], %62 {strides = array<i32>} : memref<8x32xf32, #tpu.memory_space<vmem>>, vector<8x32xf32>,
    } else {
    }
    %c0 = arith.constant 0 : index
    %c0_1 = arith.constant 0 : index
    %3 = vector.load %arg3[%c0, %c0_1] : memref<8x128xf32, #tpu.memory_space<vmem>>, vector<8x128xf32>
    %c0_2 = arith.constant 0 : index
    %c0_3 = arith.constant 0 : index
    %4 = vector.load %arg2[%c0_2, %c0_3] : memref<8x1xi32, #tpu.memory_space<vmem>>, vector<8x1xi32>
    %5 = tpu.iota {dimensions = array<i32: 1>} : vector<8x128xi32>
    %c128_i32 = arith.constant 128 : i32
    %6 = arith.muli %arg1, %c128_i32 : i32
    %7 = vector.broadcast %6 : i32 to vector<8x128xi32>
    %8 = arith.addi %5, %7 : vector<8x128xi32>
    %c16_i32 = arith.constant 16 : i32
    %9 = vector.broadcast %c16_i32 : i32 to vector<8x128xi32>
    %10 = arith.cmpi slt, %8, %9 : vector<8x128xi32>
    %cst = arith.constant 0xFF800000 : f32
    %11 = vector.broadcast %cst : f32 to vector<8x128xf32>
    %12 = arith.select %10, %3, %11 : vector<8x128xi1>, vector<8x128xf32>
    %13 = vector.broadcast %4 : vector<8x1xi32> to vector<8x128xi32>
    %14 = arith.cmpi eq, %8, %13 : vector<8x128xi32>
    %c0_4 = arith.constant 0 : index
    %c0_5 = arith.constant 0 : index
    %15 = vector.load %arg7[%c0_4, %c0_5] : memref<8x1xf32, #tpu.memory_space<vmem>>, vector<8x1xf32>
    %cst_6 = arith.constant dense<0xFF800000> : vector<8xf32>
    %16 = vector.multi_reduction <maximumf>, %12, %cst_6 [1] : vector<8x128xf32> to vector<8xf32>
    %17 = vector.shape_cast %16 : vector<8xf32> to vector<8x1xf32>
    %18 = arith.maximumf %15, %17 : vector<8x1xf32>
    %19 = arith.subf %15, %18 : vector<8x1xf32>
    %20 = math.exp %19 : vector<8x1xf32>
    %c0_7 = arith.constant 0 : index
    %c0_8 = arith.constant 0 : index
    %21 = vector.load %arg8[%c0_7, %c0_8] : memref<8x1xf32, #tpu.memory_space<vmem>>, vector<8x1xf32>
    %22 = arith.mulf %20, %21 : vector<8x1xf32>
    %23 = vector.broadcast %18 : vector<8x1xf32> to vector<8x128xf32>
    %24 = arith.subf %12, %23 : vector<8x128xf32>
    %25 = math.exp %24 : vector<8x128xf32>
    %cst_9 = arith.constant dense<0.000000e+00> : vector<8xf32>
    %26 = vector.multi_reduction <add>, %25, %cst_9 [1] : vector<8x128xf32> to vector<8xf32>
    %27 = vector.shape_cast %26 : vector<8xf32> to vector<8x1xf32>
    %28 = arith.addf %22, %27 : vector<8x1xf32>
    %c0_10 = arith.constant 0 : index
    %c0_11 = arith.constant 0 : index
    %29 = vector.load %arg8[%c0_10, %c0_11] : memref<8x1xf32, #tpu.memory_space<vmem>>, vector<8x1xf32>
    tpu.vector_store %arg8[%c0_10, %c0_11], %28 {strides = array<i32>} : memref<8x1xf32, #tpu.memory_space<vmem>>, vector<8x1xf32>,
    %c0_12 = arith.constant 0 : index
    %c0_13 = arith.constant 0 : index
    %30 = vector.load %arg7[%c0_12, %c0_13] : memref<8x1xf32, #tpu.memory_space<vmem>>, vector<8x1xf32>
    tpu.vector_store %arg7[%c0_12, %c0_13], %18 {strides = array<i32>} : memref<8x1xf32, #tpu.memory_space<vmem>>, vector<8x1xf32>,
    %c0_14 = arith.constant 0 : index
    %c0_15 = arith.constant 0 : index
    %31 = vector.load %arg9[%c0_14, %c0_15] : memref<8x1xf32, #tpu.memory_space<vmem>>, vector<8x1xf32>
    %cst_16 = arith.constant 0.000000e+00 : f32
    %32 = vector.broadcast %cst_16 : f32 to vector<8x128xf32>
    %33 = arith.select %14, %12, %32 : vector<8x128xi1>, vector<8x128xf32>
    %cst_17 = arith.constant dense<0.000000e+00> : vector<8xf32>
    %34 = vector.multi_reduction <add>, %33, %cst_17 [1] : vector<8x128xf32> to vector<8xf32>
    %35 = vector.shape_cast %34 : vector<8xf32> to vector<8x1xf32>
    %36 = arith.addf %31, %35 : vector<8x1xf32>
    %c0_18 = arith.constant 0 : index
    %c0_19 = arith.constant 0 : index
    %37 = vector.load %arg9[%c0_18, %c0_19] : memref<8x1xf32, #tpu.memory_space<vmem>>, vector<8x1xf32>
    tpu.vector_store %arg9[%c0_18, %c0_19], %36 {strides = array<i32>} : memref<8x1xf32, #tpu.memory_space<vmem>>, vector<8x1xf32>,
    %c0_20 = arith.constant 0 : index
    %c0_21 = arith.constant 0 : index
    %38 = vector.load %arg5[%c0_20, %c0_21] : memref<128x32xf32, #tpu.memory_space<vmem>>, vector<128x32xf32>
    %39 = tpu.iota {dimensions = array<i32: 0>} : vector<128x32xi32>
    %c128_i32_22 = arith.constant 128 : i32
    %40 = arith.muli %arg1, %c128_i32_22 : i32
    %41 = vector.broadcast %40 : i32 to vector<128x32xi32>
    %42 = arith.addi %39, %41 : vector<128x32xi32>
    %c16_i32_23 = arith.constant 16 : i32
    %43 = vector.broadcast %c16_i32_23 : i32 to vector<128x32xi32>
    %44 = arith.cmpi slt, %42, %43 : vector<128x32xi32>
    %cst_24 = arith.constant 0.000000e+00 : f32
    %45 = vector.broadcast %cst_24 : f32 to vector<128x32xf32>
    %46 = arith.select %44, %38, %45 : vector<128x32xi1>, vector<128x32xf32>
    %47 = arith.extui %14 : vector<8x128xi1> to vector<8x128xi32>
    %48 = arith.sitofp %47 : vector<8x128xi32> to vector<8x128xf32>
    %c0_25 = arith.constant 0 : index
    %c0_26 = arith.constant 0 : index
    %49 = vector.load %arg10[%c0_25, %c0_26] : memref<8x32xf32, #tpu.memory_space<vmem>>, vector<8x32xf32>
    %cst_27 = arith.constant dense<0.000000e+00> : vector<8x32xf32>
    %50 = tpu.matmul %48, %46, %cst_27 {dimension_numbers = #tpu.dot_dimension_numbers<[1], [0], [0], [1], [0, 0, 1, 1], [], []>} : vector<8x128xf32>, vector<128x32xf32>, vector<8x32xf32> -> vector<8x32xf32>
    %51 = arith.addf %49, %50 : vector<8x32xf32>
    %c0_28 = arith.constant 0 : index
    %c0_29 = arith.constant 0 : index
    %52 = vector.load %arg10[%c0_28, %c0_29] : memref<8x32xf32, #tpu.memory_space<vmem>>, vector<8x32xf32>
    tpu.vector_store %arg10[%c0_28, %c0_29], %51 {strides = array<i32>} : memref<8x32xf32, #tpu.memory_space<vmem>>, vector<8x32xf32>,
    %c0_i32_30 = arith.constant 0 : i32
    %53 = arith.cmpi eq, %arg1, %c0_i32_30 : i32
    %54 = arith.extui %53 : i1 to i32
    %c0_i32_31 = arith.constant 0 : i32
    %55 = arith.cmpi ne, %54, %c0_i32_31 : i32
    scf.if %55 {
      %c0_32 = arith.constant 0 : index
      %c0_33 = arith.constant 0 : index
      %56 = vector.load %arg7[%c0_32, %c0_33] : memref<8x1xf32, #tpu.memory_space<vmem>>, vector<8x1xf32>
      %c0_34 = arith.constant 0 : index
      %c0_35 = arith.constant 0 : index
      %57 = vector.load %arg8[%c0_34, %c0_35] : memref<8x1xf32, #tpu.memory_space<vmem>>, vector<8x1xf32>
      %58 = math.log %57 : vector<8x1xf32>
      %59 = arith.addf %56, %58 : vector<8x1xf32>
      %c0_36 = arith.constant 0 : index
      %c0_37 = arith.constant 0 : index
      %60 = vector.load %arg9[%c0_36, %c0_37] : memref<8x1xf32, #tpu.memory_space<vmem>>, vector<8x1xf32>
      %61 = arith.subf %59, %60 : vector<8x1xf32>
      %c0_38 = arith.constant 0 : index
      %c0_39 = arith.constant 0 : index
      %62 = vector.load %arg4[%c0_38, %c0_39] : memref<8x32xf32, #tpu.memory_space<vmem>>, vector<8x32xf32>
      %c0_40 = arith.constant 0 : index
      %c0_41 = arith.constant 0 : index
      %63 = vector.load %arg10[%c0_40, %c0_41] : memref<8x32xf32, #tpu.memory_space<vmem>>, vector<8x32xf32>
      %64 = arith.subf %62, %63 : vector<8x32xf32>
      %65 = arith.mulf %64, %64 : vector<8x32xf32>
      %cst_42 = arith.constant dense<0.000000e+00> : vector<8xf32>
      %66 = vector.multi_reduction <add>, %65, %cst_42 [1] : vector<8x32xf32> to vector<8xf32>
      %67 = vector.shape_cast %66 : vector<8xf32> to vector<8x1xf32>
      %68 = tpu.iota {dimensions = array<i32: 1>} : vector<8x128xi32>
      %c0_i32_43 = arith.constant 0 : i32
      %69 = vector.broadcast %c0_i32_43 : i32 to vector<8x128xi32>
      %70 = arith.cmpi eq, %68, %69 : vector<8x128xi32>
      %c1_i32 = arith.constant 1 : i32
      %71 = vector.broadcast %c1_i32 : i32 to vector<8x128xi32>
      %72 = arith.cmpi eq, %68, %71 : vector<8x128xi32>
      %cst_44 = arith.constant 0.000000e+00 : f32
      %73 = vector.shape_cast %67 : vector<8x1xf32> to vector<8x1xf32>
      %74 = vector.broadcast %73 : vector<8x1xf32> to vector<8x128xf32>
      %75 = vector.broadcast %cst_44 : f32 to vector<8x128xf32>
      %76 = arith.select %72, %74, %75 : vector<8x128xi1>, vector<8x128xf32>
      %77 = vector.shape_cast %61 : vector<8x1xf32> to vector<8x1xf32>
      %78 = vector.broadcast %77 : vector<8x1xf32> to vector<8x128xf32>
      %79 = arith.select %70, %78, %76 : vector<8x128xi1>, vector<8x128xf32>
      %c0_45 = arith.constant 0 : index
      %c0_46 = arith.constant 0 : index
      %80 = vector.load %arg6[%c0_45, %c0_46] : memref<8x128xf32, #tpu.memory_space<vmem>>, vector<8x128xf32>
      tpu.vector_store %arg6[%c0_45, %c0_46], %79 {strides = array<i32>} : memref<8x128xf32, #tpu.memory_space<vmem>>, vector<8x128xf32>,
    } else {
    }
    return
  }
  func.func @transform_0(%arg0: i32, %arg1: i32) -> (i32, i32) {
    %c0_i32 = arith.constant 0 : i32
    %c0_i32_0 = arith.constant 0 : i32
    return %arg0, %c0_i32 : i32, i32
  }
  func.func @transform_1(%arg0: i32, %arg1: i32) -> (i32, i32) {
    %c0_i32 = arith.constant 0 : i32
    return %arg0, %arg1 : i32, i32
  }
  func.func @transform_2(%arg0: i32, %arg1: i32) -> (i32, i32) {
    %c0_i32 = arith.constant 0 : i32
    %c0_i32_0 = arith.constant 0 : i32
    return %arg0, %c0_i32 : i32, i32
  }
  func.func @transform_3(%arg0: i32, %arg1: i32) -> (i32, i32) {
    %c0_i32 = arith.constant 0 : i32
    %c0_i32_0 = arith.constant 0 : i32
    return %arg1, %c0_i32 : i32, i32
  }
  func.func @transform_4(%arg0: i32, %arg1: i32) -> (i32, i32) {
    %c0_i32 = arith.constant 0 : i32
    %c0_i32_0 = arith.constant 0 : i32
    return %arg0, %c0_i32 : i32, i32
  }
}

</mosaic_0001>

<bundles_post_ra>
// kernel: tpu_custom_call.1
= control target key start
LH: loop header
LB: loop body
LE: loop exit
PB: predicated region body
PF: predicated region fallthrough
CT: control target
= control target key end

     0   :  { %9 = vsyncpa [#allocation7], 0  ;;  %s492_s0 = inlined_call_operand.vmem [shape: s32[8,1], index: 0, kind: input, shape index: {}]   ;;  %s493_s1 = inlined_call_operand.hbm [shape: f32[8,16], index: 1, kind: input, shape index: {}]   ;;  %s494_s2 = inlined_call_operand.hbm [shape: f32[8,32], index: 2, kind: input, shape index: {}]   ;;  %s495_s3 = inlined_call_operand.vmem [shape: f32[16,32], index: 3, kind: input, shape index: {}]   ;;  %s496_s4 = inlined_call_operand.hbm [shape: f32[8,128], index: 4, kind: output, shape index: {}]  }
   0x1   :  { %10 = vsyncpa [#allocation10], 0 }
   0x2   :  { %11 = vsyncpa [#allocation8], 0  ;;  %s398_s15 = smov [#allocation6]   ;;  %s399_s17 = smov [#allocation9]  }
   0x3   :  { %s20_s16 = sshll.u32 %s398_s15, 4  ;;  %s30_s18 = sshll.u32 %s399_s17, 4  ;;  %s21_s16 = int_to_ptr.vmem [resolvable:$true] %s20_s16  ;;  %s31_s18 = int_to_ptr.vmem [resolvable:$true] %s30_s18 }
   0x4   :  { %s326_s21 = scalar_lea.hbm %s493_s1, 128 }
   0x5   :  { %p327_p0 = scmp.ne.s32.totalorder %s493_s1, %s326_s21  ;;  %p330_p1 = scmp.lt.u32.totalorder %s326_s21, %s493_s1 }
   0x7   :  { %p332_p2 = pnand %p330_p1, %p327_p0 }
   0x9   :  { %335 = shalt.err (!%p332_p2)
}
   0xa   :  { %s336_s26 = scalar_lea.vmem %s21_s16, 128  ;;  %p341_p4 = scmp.lt.s32.totalorder %s21_s16, %s21_s16 }
   0xb   :  { %p337_p3 = scmp.ne.s32.totalorder %s21_s16, %s336_s26  ;;  %p342_p5 = scmp.lt.s32.totalorder %s336_s26, %s336_s26 }
   0xd   :  { %p343_p6 = por %p342_p5, %p341_p4 }
   0xf   :  { %p344_p7 = pnand %p343_p6, %p337_p3 }
  0x11   :  { %347 = shalt.err (!%p344_p7)
}
  0x12   :  { %23 = dma.hbm_to_vmem [thread:$0]  %s493_s1, 128, %s21_s16, [#allocation7]  }
  0x13   :  { %s348_s5 = scalar_lea.hbm %s494_s2, 128 }
  0x14   :  { %p349_p8 = scmp.ne.s32.totalorder %s494_s2, %s348_s5  ;;  %p352_p9 = scmp.lt.u32.totalorder %s348_s5, %s494_s2 }
  0x16   :  { %p354_p10 = pnand %p352_p9, %p349_p8 }
  0x18   :  { %357 = shalt.err (!%p354_p10)
}
  0x19   :  { %s358_s10 = scalar_lea.vmem %s31_s18, 128  ;;  %p363_p12 = scmp.lt.s32.totalorder %s31_s18, %s31_s18 }
  0x1a   :  { %p359_p11 = scmp.ne.s32.totalorder %s31_s18, %s358_s10  ;;  %p364_p13 = scmp.lt.s32.totalorder %s358_s10, %s358_s10 }
  0x1c   :  { %p365_p0 = por %p364_p13, %p363_p12 }
  0x1e   :  { %p366_p1 = pnand %p365_p0, %p359_p11 }
  0x20   :  { %369 = shalt.err (!%p366_p1)
}
  0x21   :  { %33 = dma.hbm_to_vmem [thread:$0]  %s494_s2, 128, %s31_s18, [#allocation10]  }
  0x22   :  { %392 = dma.done.wait [#allocation7], 128  }
  0x23   :  { %393 = vsyncadd [#allocation7], 4294967168 }
  0x24   :  { %394 = dma.done.wait [#allocation10], 128  }
  0x25   :  { %395 = vsyncadd [#allocation10], 4294967168  ;;  %v400_v0 = vmov 0   ;;  %v401_v1 = vmov 0.0|0.0   ;;  %v53_v2 = vld [vmem:[%s492_s0] sm:$0xff]  ;;  %v95_v4 = vld [vmem:[%s495_s3 + $0x8] sm:$0xff]  ;;  %v54_v8 = vlaneseq }
  0x26   :  { %318 = vset.pattern.permute.xlu0 %v400_v0  ;;  %306 = vmatprep.subr.bf16.mxu0 %v401_v1  ;;  %v94_v3 = vld [vmem:[%s495_s3] sm:$0xff]  ;;  %vm46_vm0 = vcmask 7168   ;;  %vm402_vm1 = vmmov 0   ;;  %v403_v5 = vmov 0.0   ;;  %v404_v7 = vmov -inf   ;;  %v52_v10 = vld [vmem:[#allocation6] sm:$0xff] }
  0x27   :  { %319 = vset.pattern.permute.xlu1 %v400_v0  ;;  %62 = vperm.xlu0 %318, %v53_v2   ;;  %v307_v6 = vpack.c.bf16 %v95_v4, %v94_v3  ;;  %48 = vst.msk [vmem:[#allocation3] sm:$0xff] %vm46_vm0, %v403_v5  ;;  %49 = vst.msk [vmem:[#allocation4] sm:$0xff] %vm46_vm0, %v403_v5  ;;  %v468_v9 = vand.u32 127, %v54_v8  ;;  %v405_v13 = vmov 1.0   ;;  %vm50_vm4 = vcmask 261120   ;;  %v261_v30 = vld [vmem:[#allocation9] sm:$0xff] }
  0x28   :  { %303 = vmatprep.mubr.msk.f32.mxu0 %vm402_vm1, %v403_v5  ;;  %47 = vst.msk [vmem:[#allocation2] sm:$0xff] %vm46_vm0, %v404_v7  ;;  %s406_s0 = smov [#allocation11]  }
  0x29   :  { %308 = vmatpush3.bf16.msra.mxu0 %v307_v6  ;;  %vm59_vm2 = vcmp.lt.s32.totalorder %v468_v9, 16  ;;  %51 = vst.msk [vmem:[#allocation5] sm:$0xff] %vm50_vm4, %v403_v5  ;;  %vm269_vm5 = vcmp.eq.s32.totalorder %v468_v9, 1  ;;  %s284_s3 = sshll.u32 %s406_s0, 4  ;;  %vm268_vm6 = vcmp.eq.s32.totalorder %v468_v9, 0  ;;  %s285_s3 = int_to_ptr.vmem [resolvable:$true] %s284_s3 }
  0x2a   :  { %v60_v11 = vsel %vm59_vm2, %v52_v10, -inf  ;;  %s370_s17 = scalar_lea.vmem %s285_s3, 128  ;;  %p375_p3 = scmp.lt.s32.totalorder %s285_s3, %s285_s3 }
  0x2b   :  { %p371_p2 = scmp.ne.s32.totalorder %s285_s3, %s370_s17  ;;  %p376_p4 = scmp.lt.s32.totalorder %s370_s17, %s370_s17 }
  0x2d   :  { %p377_p5 = por %p376_p4, %p375_p3 }
  0x2e   :  { %v88_v19 = vld [vmem:[#allocation4] sm:$0xff]  ;;  %v72_v37 = vld [vmem:[#allocation3] sm:$0xff] }
  0x2f   :  { %v65_v15 = vld [vmem:[#allocation2] sm:$0xff]  ;;  %p378_p6 = pnand %p377_p5, %p371_p2 }
  0x30   :  { %v177_v26 = vld [vmem:[#allocation5] sm:$0xff] }
  0x46   :  { %66 = vmax.xlane.f32.xlu0 %v60_v11 }
  0xa6   :  { %v63_v12 = vpop.permute.xlu0 %62 }
  0xa7   :  { %vm64_vm3 = vcmp.eq.s32.totalorder %v468_v9, %v63_v12 }
  0xa8   :  { %304 = vmatmul.mubr.msk.f32.vlgmr.msra.gmra.mrb[0].mxu0 %vm64_vm3, %v405_v13  ;;  %v89_v14 = vsel %vm64_vm3, %v60_v11, 0.0 }
  0xa9   :  { %90 = vadd.xlane.f32.xlu0 %v89_v14 }
  0xd3   :  { %v67_v16 = vpop.xlane.xlu0 %66 }
  0xd4   :  { %v68_v17 = vmax.f32 %v65_v15, %v67_v16 }
  0xd6   :  { %v69_v18 = vsub.f32 %v65_v15, %v68_v17  ;;  %87 = vst.msk [vmem:[#allocation2] sm:$0xff] %vm46_vm0, %v68_v17  ;;  %76 = vperm.xlu1 %319, %v68_v17  }
  0xd8   :  { %v70_v35 = vmul.f32 1.442695, %v69_v18 }
  0xdd   :  { %v254_v44 = vld [vmem:[#allocation2] sm:$0xff] }
 0x136   :  { %v91_v20 = vpop.xlane.xlu0 %90 }
 0x137   :  { %v92_v21 = vadd.f32 %v91_v20, %v88_v19 }
 0x139   :  { %93 = vst.msk [vmem:[#allocation4] sm:$0xff] %vm46_vm0, %v92_v21 }
 0x140   :  { %v259_v46 = vld [vmem:[#allocation4] sm:$0xff] }
 0x155   :  { %v77_v22 = vpop.permute.xlu1 %76 }
 0x156   :  { %v79_v23 = vsub.f32 %v60_v11, %v77_v22 }
 0x158   :  { %v80_v24 = vmul.f32 1.442695, %v79_v23 }
 0x15a   :  { %320 = vpow2.f32 %v80_v24 }
 0x15b   :  { %322 = vpow2.f32 %v70_v35 }
 0x164   :  { %v321_v25 = vpop.eup %320 }
 0x165   :  { %82 = vadd.xlane.f32.xlu1 %v321_v25  ;;  %v323_v36 = vpop.eup %322 }
 0x166   :  { %v73_v38 = vmul.f32 %v323_v36, %v72_v37 }
 0x17b   :  { %v244_v27 = vpop.f32.mrb[0].mxu0 }
 0x17c   :  { %v248_v28 = vadd.f32 %v244_v27, %v177_v26  ;;  %v305_v29 = vpop.f32.mrb[1].mxu0 }
 0x17e   :  { %250 = vst.msk [vmem:[#allocation5] sm:$0xff] %vm50_vm4, %v248_v28 }
 0x185   :  { %v262_v31 = vld [vmem:[#allocation5] sm:$0xff] }
 0x186   :  { %v263_v32 = vsub.f32 %v261_v30, %v262_v31 }
 0x188   :  { %v264_v33 = vmul.f32 %v263_v32, %v263_v32 }
 0x18a   :  { %v265_v34 = vsel %vm50_vm4, %v264_v33, 0.0 }
 0x18b   :  { %266 = vadd.xlane.f32.xlu0 %v265_v34 }
 0x1f2   :  { %v83_v39 = vpop.xlane.xlu1 %82 }
 0x1f3   :  { %v84_v40 = vadd.f32 %v83_v39, %v73_v38 }
 0x1f5   :  { %86 = vst.msk [vmem:[#allocation3] sm:$0xff] %vm46_vm0, %v84_v40 }
 0x1fc   :  { %v255_v41 = vld [vmem:[#allocation3] sm:$0xff] }
 0x1fd   :  { %324 = vlog2.f32 %v255_v41 }
 0x207   :  { %v325_v42 = vpop.eup %324 }
 0x208   :  { %v257_v43 = vmul.f32 0.6931472, %v325_v42 }
 0x20a   :  { %v258_v45 = vadd.f32 %v257_v43, %v254_v44 }
 0x20c   :  { %v260_v47 = vsub.f32 %v258_v45, %v259_v46 }
 0x20e   :  { %273 = vperm.xlu1 %319, %v260_v47  }
 0x218   :  { %v267_v48 = vpop.xlane.xlu0 %266 }
 0x219   :  { %v270_v49 = vsel %vm269_vm5, %v267_v48, 0.0 }
 0x28d   :  { %v274_v50 = vpop.permute.xlu1 %273 }
 0x28e   :  { %v276_v51 = vsel %vm268_vm6, %v274_v50, %v270_v49 }
 0x28f   :  { %277 = vst [vmem:[#allocation11] sm:$0xff] %v276_v51 }
 0x290   :  { %381 = shalt.err (!%p378_p6)
}
 0x291   :  { %s382_s20 = scalar_lea.hbm %s496_s4, 128 }
 0x292   :  { %p383_p7 = scmp.ne.s32.totalorder %s496_s4, %s382_s20  ;;  %p386_p8 = scmp.lt.u32.totalorder %s382_s20, %s496_s4 }
 0x294   :  { %p388_p9 = pnand %p386_p8, %p383_p7 }
 0x296   :  { %391 = shalt.err (!%p388_p9)
}
 0x297   :  { %287 = dma.vmem_to_hbm [thread:$0]  %s285_s3, 128, %s496_s4, [#allocation8]  }
 0x298   :  { %396 = dma.done.wait [#allocation8], 128  }
 0x299   :  { %397 = vsyncadd [#allocation8], 4294967168 }
 0x29a   :  { %291 = vsyncpa [#allocation7], 1 }
 0x29b   :  { %292 = vsyncpa [#allocation10], 1 }
 0x29c   :  { %293 = vsyncpa [#allocation8], 1 }

</bundles_post_ra>
